<compile_context>
chip_gen: v7x
topology: tpu7x:2x2x1
jax: 0.10.0
libtpu: 0.0.40
codegen_flags: <defaults>
</compile_context>

<pallas_src>
import jax
import jax.numpy as jnp
import numpy as np
from jax.experimental import pallas as pl
from jax.experimental.pallas import tpu as pltpu

D_H1 = 20                 # hidden width of first Linear (nn.Linear(D, 20))
D_H2 = 10                 # hidden width of second Linear (nn.Linear(20, 10))
PACKED_K = 2 * D_H2 + 2   # 10 (mu) + 10 (log_var) + 2 one-hot bias rows = 22


def vi_kernel(h2_ref, w3b_ref, eps_ref, z_ref, mu_ref, lv_ref):
    """One column tile of the output dimension D.

    h2_ref : (2B, PACKED_K)   block-diag activations + one-hot bias columns
                              [[h2_mu, 0, 1, 0], [0, h2_logvar, 0, 1]]
    w3b_ref: (PACKED_K, tile_d) row-stacked [w3_mu ; w3_logvar ; b3_mu ; b3_logvar]
    eps_ref: (B, tile_d)
    """
    B = mu_ref.shape[0]

    # One fused MXU dot computes mu (rows [0, B)) and log_var (rows [B, 2B))
    # for this tile, biases included via the one-hot columns.
    y = jnp.dot(h2_ref[...], w3b_ref[...], preferred_element_type=jnp.float32)
    mu = y[:B, :]
    lv = y[B:, :]

    # Reparameterize (sigma uses the clipped log_var; log_var is returned
    # UN-clipped, matching the PyTorch module).
    sigma = jnp.exp(0.5 * jnp.clip(lv, -10.0, 10.0)) + 1e-5

    mu_ref[...] = mu
    lv_ref[...] = lv
    z_ref[...] = mu + sigma * eps_ref[...]


def pack_vi_params(params, *, w3_dtype=jnp.float32):
    """ONE-TIME packing of the 12 Linear params — call at weight-load time.

    Returns (w1, b1, w2, b2, w3b):
      w1  : (D, 2*D_H1)       = [w1_mu | w1_logvar]        -> x read once
      b1  : (1, 2*D_H1)
      w2  : (2*D_H1, 2*D_H2)  = blockdiag(w2_mu, w2_logvar)
      b2  : (1, 2*D_H2)
      w3b : (PACKED_K, D)     = [w3_mu ; w3_logvar ; b3_mu ; b3_logvar]
            (optionally bf16 to halve the kernel's dominant HBM read)
    """
    (w1m, b1m, w2m, b2m, w3m, b3m,
     w1v, b1v, w2v, b2v, w3v, b3v) = params
    w1 = jnp.concatenate([w1m, w1v], axis=1)
    b1 = jnp.concatenate([b1m, b1v], axis=1)
    z = jnp.zeros_like(w2m)
    w2 = jnp.concatenate(
        [jnp.concatenate([w2m, z], axis=1),
         jnp.concatenate([z, w2v], axis=1)], axis=0)
    b2 = jnp.concatenate([b2m, b2v], axis=1)
    w3b = jnp.concatenate([w3m, w3v, b3m, b3v], axis=0).astype(w3_dtype)
    return w1, b1, w2, b2, w3b


def _choose_tile_d(D, max_tile_d):
    """Largest divisor of D that is a multiple of 128 and <= max_tile_d."""
    assert D % 128 == 0, "D must be a multiple of 128"
    n_blocks = D // 128
    for n_steps in range(1, n_blocks + 1):
        if n_blocks % n_steps == 0 and D // n_steps <= max_tile_d:
            return D // n_steps
    return 128


def vi_forward(x, packed_params, eps, *, max_tile_d=20480, core_parallel=False):
    """Forward pass of VI. `packed_params` comes from pack_vi_params()."""
    B, D = x.shape
    w1, b1, w2, b2, w3b = packed_params

    # --- Tiny front MLP hoisted into XLA, fused across both heads so x is
    #     streamed from HBM exactly once. ---
    h1 = jnp.maximum(x @ w1 + b1, 0.0)        # (B, 2*D_H1)
    h2 = jnp.maximum(h1 @ w2 + b2, 0.0)       # (B, 2*D_H2): [:, :10]=mu, [:, 10:]=lv

    # Block-diagonal layout + one-hot bias columns (tiny: (2B, 22)).
    zeros_h = jnp.zeros((B, D_H2), h2.dtype)
    one_c = jnp.ones((B, 1), h2.dtype)
    zero_c = jnp.zeros((B, 1), h2.dtype)
    h2_blk = jnp.concatenate(
        [jnp.concatenate([h2[:, :D_H2], zeros_h, one_c, zero_c], axis=1),
         jnp.concatenate([zeros_h, h2[:, D_H2:], zero_c, one_c], axis=1)],
        axis=0).astype(w3b.dtype)             # (2B, PACKED_K)

    # --- Column-tiled, memory-bound projection kernel. ---
    tile_d = _choose_tile_d(D, max_tile_d)
    grid = (D // tile_d,)

    def col(rows):
        return pl.BlockSpec((rows, tile_d), lambda j: (0, j))

    in_specs = [
        pl.BlockSpec((2 * B, PACKED_K), lambda j: (0, 0)),   # tiny, grid-invariant
        col(PACKED_K),                                        # packed [w3 ; b3]
        col(B),                                               # eps
    ]
    out_specs = (col(B), col(B), col(B))
    out_shape = (jax.ShapeDtypeStruct((B, D), jnp.float32),   # z
                 jax.ShapeDtypeStruct((B, D), jnp.float32),   # mu
                 jax.ShapeDtypeStruct((B, D), jnp.float32))   # log_var

    # On v7x megacore parts, CORE_PARALLEL gives a genuine 2-TensorCore split
    # of the independent column tiles; plain "parallel" is the safe default.
    semantics = (pltpu.CORE_PARALLEL if core_parallel else "parallel",)

    return pl.pallas_call(
        vi_kernel,
        out_shape=out_shape,
        grid=grid,
        in_specs=in_specs,
        out_specs=out_specs,
        compiler_params=pltpu.CompilerParams(dimension_semantics=semantics),
    )(h2_blk, w3b, eps)


def init_linear(key, fan_in, fan_out):
    # mimic PyTorch nn.Linear default init: U(-1/sqrt(fan_in), 1/sqrt(fan_in))
    kw, kb = jax.random.split(key)
    bound = 1.0 / np.sqrt(fan_in)
    w = jax.random.uniform(kw, (fan_in, fan_out), jnp.float32, -bound, bound)
    b = jax.random.uniform(kb, (1, fan_out), jnp.float32, -bound, bound)
    return w, b


def init_params(key, d):
    keys = jax.random.split(key, 6)
    w1m, b1m = init_linear(keys[0], d, D_H1)
    w2m, b2m = init_linear(keys[1], D_H1, D_H2)
    w3m, b3m = init_linear(keys[2], D_H2, d)
    w1v, b1v = init_linear(keys[3], d, D_H1)
    w2v, b2v = init_linear(keys[4], D_H1, D_H2)
    w3v, b3v = init_linear(keys[5], D_H2, d)
    return (w1m, b1m, w2m, b2m, w3m, b3m,
            w1v, b1v, w2v, b2v, w3v, b3v)


def vi_reference(x, params, eps):
    (w1m, b1m, w2m, b2m, w3m, b3m,
     w1v, b1v, w2v, b2v, w3v, b3v) = params
    h = jnp.maximum(x @ w1m + b1m, 0.0)
    h = jnp.maximum(h @ w2m + b2m, 0.0)
    mu = h @ w3m + b3m
    g = jnp.maximum(x @ w1v + b1v, 0.0)
    g = jnp.maximum(g @ w2v + b2v, 0.0)
    lv = g @ w3v + b3v
    sigma = jnp.exp(0.5 * jnp.clip(lv, -10.0, 10.0)) + 1e-5
    return mu + sigma * eps, mu, lv


if __name__ == "__main__":
    # Small shapes consistent with the module: D = C*H*W = 3*16*16 = 768
    # (the real module uses 3*224*224 = 150528; the kernel only requires
    # D % 128 == 0 and then auto-tiles to ~8 column steps at that size).
    B, C, H, W = 2, 3, 16, 16
    D = C * H * W

    key = jax.random.PRNGKey(0)
    k_x, k_eps, k_p = jax.random.split(key, 3)

    x = jax.random.normal(k_x, (B, D), jnp.float32)
    # TODO(synk): torch.randn_like's in-graph RNG has no exact equivalent here;
    # eps is drawn with jax.random.normal and streamed to the kernel.  An
    # in-kernel pltpu.prng_seed + stateful_normal draw would remove this B*D
    # read but makes the output non-comparable to a fixed reference.
    eps = jax.random.normal(k_eps, (B, D), jnp.float32)

    params = init_params(k_p, D)
    packed = pack_vi_params(params)      # one-time packing (weight-load time)

    z, mu, lv = vi_forward(x, packed, eps)
    jax.block_until_ready((z, mu, lv))

    z_ref, mu_ref, lv_ref = vi_reference(x, params, eps)
    np.testing.assert_allclose(np.asarray(mu), np.asarray(mu_ref), rtol=1e-5, atol=1e-5)
    np.testing.assert_allclose(np.asarray(lv), np.asarray(lv_ref), rtol=1e-5, atol=1e-5)
    np.testing.assert_allclose(np.asarray(z), np.asarray(z_ref), rtol=1e-5, atol=1e-5)

    print("KERNEL_OK")
</pallas_src>

<mosaic_0001>
module attributes {stable_mosaic.version = 11 : i64} {
  func.func @vi_kernel(%arg0: i32, %arg1: memref<4x22xf32, #tpu.memory_space<vmem>>, %arg2: memref<22x768xf32, #tpu.memory_space<vmem>>, %arg3: memref<2x768xf32, #tpu.memory_space<vmem>>, %arg4: memref<2x768xf32, #tpu.memory_space<vmem>>, %arg5: memref<2x768xf32, #tpu.memory_space<vmem>>, %arg6: memref<2x768xf32, #tpu.memory_space<vmem>>) attributes {dimension_semantics = [#tpu.dimension_semantics<parallel>], iteration_bounds = array<i64: 1>, scalar_prefetch = 0 : i64, scratch_operands = 0 : i64, tpu.core_type = #tpu.core_type<tc>, window_params = [{pipeline_mode = #tpu.pipeline_mode<synchronous>, transform_indices = @transform_0, window_bounds = array<i64: 4, 22>}, {transform_indices = @transform_1, window_bounds = array<i64: 22, 768>}, {transform_indices = @transform_2, window_bounds = array<i64: 2, 768>}, {transform_indices = @transform_3, window_bounds = array<i64: 2, 768>}, {transform_indices = @transform_4, window_bounds = array<i64: 2, 768>}, {transform_indices = @transform_5, window_bounds = array<i64: 2, 768>}]} {
    %c0 = arith.constant 0 : index
    %c0_0 = arith.constant 0 : index
    %0 = vector.load %arg1[%c0, %c0_0] : memref<4x22xf32, #tpu.memory_space<vmem>>, vector<4x22xf32>
    %c0_1 = arith.constant 0 : index
    %c0_2 = arith.constant 0 : index
    %1 = vector.load %arg2[%c0_1, %c0_2] : memref<22x768xf32, #tpu.memory_space<vmem>>, vector<22x768xf32>
    %cst = arith.constant dense<0.000000e+00> : vector<4x768xf32>
    %2 = tpu.matmul %0, %1, %cst {dimension_numbers = #tpu.dot_dimension_numbers<[1], [0], [0], [1], [0, 0, 1, 1], [], []>} : vector<4x22xf32>, vector<22x768xf32>, vector<4x768xf32> -> vector<4x768xf32>
    %3 = vector.extract_strided_slice %2 {offsets = [0, 0], sizes = [2, 768], strides = [1, 1]} : vector<4x768xf32> to vector<2x768xf32>
    %4 = vector.extract_strided_slice %2 {offsets = [2, 0], sizes = [2, 768], strides = [1, 1]} : vector<4x768xf32> to vector<2x768xf32>
    %cst_3 = arith.constant -1.000000e+01 : f32
    %cst_4 = arith.constant 1.000000e+01 : f32
    %5 = vector.broadcast %cst_3 : f32 to vector<2x768xf32>
    %6 = arith.maximumf %5, %4 : vector<2x768xf32>
    %7 = vector.broadcast %cst_4 : f32 to vector<2x768xf32>
    %8 = arith.minimumf %7, %6 : vector<2x768xf32>
    %cst_5 = arith.constant 5.000000e-01 : f32
    %9 = vector.broadcast %cst_5 : f32 to vector<2x768xf32>
    %10 = arith.mulf %9, %8 : vector<2x768xf32>
    %11 = math.exp %10 : vector<2x768xf32>
    %cst_6 = arith.constant 9.99999974E-6 : f32
    %12 = vector.broadcast %cst_6 : f32 to vector<2x768xf32>
    %13 = arith.addf %11, %12 : vector<2x768xf32>
    %c0_7 = arith.constant 0 : index
    %c0_8 = arith.constant 0 : index
    %14 = vector.load %arg5[%c0_7, %c0_8] : memref<2x768xf32, #tpu.memory_space<vmem>>, vector<2x768xf32>
    tpu.vector_store %arg5[%c0_7, %c0_8], %3 {strides = array<i32>} : memref<2x768xf32, #tpu.memory_space<vmem>>, vector<2x768xf32>,
    %c0_9 = arith.constant 0 : index
    %c0_10 = arith.constant 0 : index
    %15 = vector.load %arg6[%c0_9, %c0_10] : memref<2x768xf32, #tpu.memory_space<vmem>>, vector<2x768xf32>
    tpu.vector_store %arg6[%c0_9, %c0_10], %4 {strides = array<i32>} : memref<2x768xf32, #tpu.memory_space<vmem>>, vector<2x768xf32>,
    %c0_11 = arith.constant 0 : index
    %c0_12 = arith.constant 0 : index
    %16 = vector.load %arg3[%c0_11, %c0_12] : memref<2x768xf32, #tpu.memory_space<vmem>>, vector<2x768xf32>
    %17 = arith.mulf %13, %16 : vector<2x768xf32>
    %18 = arith.addf %3, %17 : vector<2x768xf32>
    %c0_13 = arith.constant 0 : index
    %c0_14 = arith.constant 0 : index
    %19 = vector.load %arg4[%c0_13, %c0_14] : memref<2x768xf32, #tpu.memory_space<vmem>>, vector<2x768xf32>
    tpu.vector_store %arg4[%c0_13, %c0_14], %18 {strides = array<i32>} : memref<2x768xf32, #tpu.memory_space<vmem>>, vector<2x768xf32>,
    return
  }
  func.func @transform_0(%arg0: i32) -> (i32, i32) {
    %c0_i32 = arith.constant 0 : i32
    %c0_i32_0 = arith.constant 0 : i32
    %c0_i32_1 = arith.constant 0 : i32
    return %c0_i32, %c0_i32_0 : i32, i32
  }
  func.func @transform_1(%arg0: i32) -> (i32, i32) {
    %c0_i32 = arith.constant 0 : i32
    %c0_i32_0 = arith.constant 0 : i32
    return %c0_i32, %arg0 : i32, i32
  }
  func.func @transform_2(%arg0: i32) -> (i32, i32) {
    %c0_i32 = arith.constant 0 : i32
    %c0_i32_0 = arith.constant 0 : i32
    return %c0_i32, %arg0 : i32, i32
  }
  func.func @transform_3(%arg0: i32) -> (i32, i32) {
    %c0_i32 = arith.constant 0 : i32
    %c0_i32_0 = arith.constant 0 : i32
    return %c0_i32, %arg0 : i32, i32
  }
  func.func @transform_4(%arg0: i32) -> (i32, i32) {
    %c0_i32 = arith.constant 0 : i32
    %c0_i32_0 = arith.constant 0 : i32
    return %c0_i32, %arg0 : i32, i32
  }
  func.func @transform_5(%arg0: i32) -> (i32, i32) {
    %c0_i32 = arith.constant 0 : i32
    %c0_i32_0 = arith.constant 0 : i32
    return %c0_i32, %arg0 : i32, i32
  }
}

</mosaic_0001>

<bundles_post_ra>
// kernel: tpu_custom_call.1
= control target key start
LH: loop header
LB: loop body
LE: loop exit
PB: predicated region body
PF: predicated region fallthrough
CT: control target
= control target key end

     0   :  { %11 = vsyncpa [#allocation3], 0  ;;  %s886_s0 = inlined_call_operand.hbm [shape: f32[4,22], index: 0, kind: input, shape index: {}]   ;;  %s887_s1 = inlined_call_operand.hbm [shape: f32[22,768], index: 1, kind: input, shape index: {}]   ;;  %s888_s2 = inlined_call_operand.hbm [shape: f32[2,768], index: 2, kind: input, shape index: {}]   ;;  %s889_s3 = inlined_call_operand.hbm [shape: f32[2,768], index: 3, kind: output, shape index: {0}]   ;;  %s890_s4 = inlined_call_operand.hbm [shape: f32[2,768], index: 4, kind: output, shape index: {1}]   ;;  %s891_s5 = inlined_call_operand.hbm [shape: f32[2,768], index: 5, kind: output, shape index: {2}]  }
   0x1   :  { %12 = vsyncpa [#allocation6], 0 }
   0x2   :  { %13 = vsyncpa [#allocation4], 0 }
   0x3   :  { %14 = vsyncpa [#allocation10], 0  ;;  %s725_s18 = smov [#allocation5]   ;;  %s585_s22 = scalar_lea.hbm %s887_s1, 2304 }
   0x4   :  { %s30_s19 = sshll.u32 %s725_s18, 4  ;;  %p586_p0 = scmp.ne.s32.totalorder %s887_s1, %s585_s22  ;;  %s31_s19 = int_to_ptr.vmem [resolvable:$true] %s30_s19 }
   0x5   :  { %p589_p1 = scmp.lt.u32.totalorder %s585_s22, %s887_s1 }
   0x7   :  { %p591_p2 = pnand %p589_p1, %p586_p0 }
   0x9   :  { %594 = shalt.err (!%p591_p2)
}
   0xa   :  { %s595_s27 = scalar_lea.vmem %s31_s19, 2304  ;;  %p600_p4 = scmp.lt.s32.totalorder %s31_s19, %s31_s19 }
   0xb   :  { %p596_p3 = scmp.ne.s32.totalorder %s31_s19, %s595_s27  ;;  %p601_p5 = scmp.lt.s32.totalorder %s595_s27, %s595_s27 }
   0xd   :  { %p602_p6 = por %p601_p5, %p600_p4 }
   0xf   :  { %p603_p7 = pnand %p602_p6, %p596_p3 }
  0x11   :  { %606 = shalt.err (!%p603_p7)
}
  0x12   :  { %s726_s28 = smov 768   ;;  %s727_s29 = smov 48  }
  0x13   :  { %36 = dma.hbm_to_vmem [thread:$0]  %s887_s1, 2304, %s31_s19, [#allocation6], %s726_s28, %s726_s28, %s727_s29  }
  0x14   :  { %s728_s7 = smov [#allocation2]   ;;  %s729_s9 = smov [#allocation7]  }
  0x15   :  { %s21_s8 = sshll.u32 %s728_s7, 4  ;;  %s43_s10 = sshll.u32 %s729_s9, 4  ;;  %s22_s8 = int_to_ptr.vmem [resolvable:$true] %s21_s8  ;;  %s44_s10 = int_to_ptr.vmem [resolvable:$true] %s43_s10 }
  0x16   :  { %s607_s13 = scalar_lea.hbm %s886_s0, 64 }
  0x17   :  { %p608_p8 = scmp.ne.s32.totalorder %s886_s0, %s607_s13  ;;  %p611_p9 = scmp.lt.u32.totalorder %s607_s13, %s886_s0 }
  0x19   :  { %p613_p10 = pnand %p611_p9, %p608_p8 }
  0x1b   :  { %616 = shalt.err (!%p613_p10)
}
  0x1c   :  { %s617_s1 = scalar_lea.vmem %s22_s8, 64  ;;  %p622_p12 = scmp.lt.s32.totalorder %s22_s8, %s22_s8 }
  0x1d   :  { %p618_p11 = scmp.ne.s32.totalorder %s22_s8, %s617_s1  ;;  %p623_p13 = scmp.lt.s32.totalorder %s617_s1, %s617_s1 }
  0x1f   :  { %p624_p0 = por %p623_p13, %p622_p12 }
  0x21   :  { %p625_p1 = pnand %p624_p0, %p618_p11 }
  0x23   :  { %628 = shalt.err (!%p625_p1)
}
  0x24   :  { %24 = dma.hbm_to_vmem [thread:$0]  %s886_s0, 64, %s22_s8, [#allocation3]  }
  0x25   :  { %s629_s22 = scalar_lea.hbm %s888_s2, 192 }
  0x26   :  { %p630_p2 = scmp.ne.s32.totalorder %s888_s2, %s629_s22  ;;  %p633_p3 = scmp.lt.u32.totalorder %s629_s22, %s888_s2 }
  0x28   :  { %p635_p4 = pnand %p633_p3, %p630_p2 }
  0x2a   :  { %638 = shalt.err (!%p635_p4)
}
  0x2b   :  { %s639_s27 = scalar_lea.vmem %s44_s10, 192  ;;  %p644_p6 = scmp.lt.s32.totalorder %s44_s10, %s44_s10 }
  0x2c   :  { %p640_p5 = scmp.ne.s32.totalorder %s44_s10, %s639_s27  ;;  %p645_p7 = scmp.lt.s32.totalorder %s639_s27, %s639_s27 }
  0x2e   :  { %p646_p8 = por %p645_p7, %p644_p6 }
  0x30   :  { %p647_p9 = pnand %p646_p8, %p640_p5 }
  0x32   :  { %650 = shalt.err (!%p647_p9)
}
  0x33   :  { %46 = dma.hbm_to_vmem [thread:$0]  %s888_s2, 192, %s44_s10, [#allocation6]  }
  0x34   :  { %717 = dma.done.wait [#allocation3], 64  }
  0x35   :  { %718 = vsyncadd [#allocation3], 4294967232 }
  0x36   :  { %719 = dma.done.wait [#allocation6], 2496  }
  0x37   :  { %720 = vsyncadd [#allocation6], 4294964800  ;;  %v730_v0 = vmov 0.0   ;;  %v58_v1 = vld [vmem:[#allocation5 + $0x8] sm:$0xff]  ;;  %v64_v2 = vld [vmem:[#allocation5 + $0x38] sm:$0xff]  ;;  %vm79_vm0 = vcmask 1045504   ;;  %v358_v28 = vlaneseq }
  0x38   :  { %162 = vmatprep.mubr.f32.mxu0 %v730_v0  ;;  %233 = vmatprep.mubr.f32.mxu1 %v730_v0  ;;  %v60_v3 = vld [vmem:[#allocation5 + $0x18] sm:$0xff]  ;;  %v549_v4 = vpack.c.bf16 %v64_v2, %v58_v1  ;;  %v66_v5 = vld [vmem:[#allocation5 + $0x48] sm:$0xff]  ;;  %v57_v6 = vld [vmem:[#allocation5] sm:$0xff]  ;;  %vm75_vm1 = vcmask 179200   ;;  %v731_v26 = vmov 1983009808  }
  0x39   :  { %v63_v7 = vld [vmem:[#allocation5 + $0x30] sm:$0xff]  ;;  %v553_v8 = vpack.c.bf16 %v66_v5, %v60_v3  ;;  %v65_v11 = vld [vmem:[#allocation5 + $0x40] sm:$0xff]  ;;  %v70_v12 = vld [vmem:[#allocation5 + $0x68] sm:$0x3f]  ;;  %v356_v27 = vunpack.c.l.s4 %v731_v26  ;;  %v359_v30 = vshrl.u32 %v358_v28, 7  ;;  %s732_s2 = smov [#allocation9]  }
  0x3a   :  { %v551_v9 = vpack.c.bf16 %v63_v7, %v57_v6  ;;  %v59_v10 = vld [vmem:[#allocation5 + $0x10] sm:$0xff]  ;;  %550 = vmatprep.subr.bf16.mxu0 %v549_v4  ;;  %v72_v14 = vld [vmem:[#allocation5 + $0x78] sm:$0x3f]  ;;  %v62_v15 = vld [vmem:[#allocation5 + $0x28] sm:$0xff]  ;;  %s505_s29 = sshll.u32 %s732_s2, 4  ;;  %s733_s30 = smov [#allocation11]   ;;  %s506_s29 = int_to_ptr.vmem [resolvable:$true] %s505_s29 }
  0x3b   :  { %v555_v13 = vpack.c.bf16 %v65_v11, %v59_v10  ;;  %554 = vmatprep.subr.bf16.mxu1 %v553_v8  ;;  %v68_v16 = vld [vmem:[#allocation5 + $0x58] sm:$0xff]  ;;  %v69_v17 = vld [vmem:[#allocation5 + $0x60] sm:$0x3f]  ;;  %v67_v19 = vld [vmem:[#allocation5 + $0x50] sm:$0xff]  ;;  %v357_v29 = vunpack.c.0.s8 %v356_v27  ;;  %s515_s6 = sshll.u32 %s733_s30, 4  ;;  %s651_s7 = scalar_lea.vmem %s506_s29, 192  ;;  %s516_s6 = int_to_ptr.vmem [resolvable:$true] %s515_s6 }
  0x3c   :  { %552 = vmatpush1.bf16.msra.mxu0 %v551_v9  ;;  %v61_v18 = vld [vmem:[#allocation5 + $0x20] sm:$0xff]  ;;  %v71_v20 = vld [vmem:[#allocation5 + $0x70] sm:$0x3f]  ;;  %v56_v21 = vld [vmem:[#allocation2] sm:$0xf]  ;;  %v557_v22 = vpack.c.bf16 %v68_v16, %v62_v15  ;;  %p652_p10 = scmp.ne.s32.totalorder %s506_s29, %s651_s7  ;;  %p656_p11 = scmp.lt.s32.totalorder %s506_s29, %s506_s29 }
  0x3d   :  { %556 = vmatpush1.bf16.msra.mxu1 %v555_v13  ;;  %532 = vmatprep.subr.msk.mxu0 %vm79_vm0, %v70_v12  ;;  %v559_v23 = vpack.c.bf16 %v67_v19, %v61_v18  ;;  %v74_v24 = vld [vmem:[#allocation5 + $0x88] sm:$0x3f]  ;;  %v73_v25 = vld [vmem:[#allocation5 + $0x80] sm:$0x3f]  ;;  %v812_v32 = vsub.s32 %v357_v29, %v359_v30  ;;  %v388_v51 = vld [vmem:[#allocation7] sm:$0xff]  ;;  %p657_p12 = scmp.lt.s32.totalorder %s651_s7, %s651_s7 }
  0x3e   :  { %535 = vmatprep.subr.msk.mxu1 %vm79_vm0, %v72_v14  ;;  %v392_v60 = vcombine.low %v388_v51, %v388_v51 }
  0x3f   :  { %p658_p13 = por %p657_p12, %p656_p11 }
  0x40   :  { %533 = vmatpush1.msk.msra.mxu0 %vm79_vm0, %v69_v17 }
  0x41   :  { %536 = vmatpush1.msk.msra.mxu1 %vm79_vm0, %v71_v20  ;;  %534 = vmatmul.mubr.msk.f32.vlgmr.msra.gmra.mrb[0].mxu0 %vm75_vm1, %v56_v21  ;;  %p659_p0 = pnand %p658_p13, %p652_p10 }
  0x42   :  { %537 = vmatmul.mubr.msk.f32.vlgmr.msra.gmra.mrb[0].mxu1 %vm75_vm1, %v56_v21  ;;  %558 = vmatprep.subr.bf16.mxu0 %v557_v22 }
  0x43   :  { %560 = vmatpush1.bf16.msra.mxu0 %v559_v23  ;;  %304 = vmatprep.mubr.f32.mxu0 %v730_v0 }
  0x44   :  { %538 = vmatprep.subr.msk.mxu0 %vm79_vm0, %v74_v24 }
  0x47   :  { %539 = vmatpush1.msk.msra.mxu0 %vm79_vm0, %v73_v25 }
  0x48   :  { %540 = vmatmul.mubr.msk.f32.vlgmr.msra.gmra.mrb[2].mxu0 %vm75_vm1, %v56_v21 }
 0x114   :  { %v810_v31 = vpop.f32.mrb[0].mxu0 }
 0x115   :  { %v541_v33 = vclamps-f32 %v810_v31, 10.0  ;;  %v815_v34 = vpop.f32.mrb[0].mxu1  ;;  %v817_v35 = vpop.f32.mrb[1].mxu0 }
 0x116   :  { %v543_v36 = vclamps-f32 %v815_v34, 10.0  ;;  %v542_v37 = vclamps-f32 %v817_v35, 10.0  ;;  %v353_v38 = vcombine.low %v810_v31, %v817_v35  ;;  %v823_v39 = vpop.f32.mrb[1].mxu1 }
 0x117   :  { %v323_v40 = vmul.f32 0.5, %v541_v33  ;;  %v544_v41 = vclamps-f32 %v823_v39, 10.0  ;;  %v354_v42 = vcombine.low %v815_v34, %v823_v39 }
 0x118   :  { %v325_v43 = vmul.f32 0.5, %v543_v36  ;;  %v324_v44 = vmul.f32 0.5, %v542_v37  ;;  %v361_v45 = vrot.slane %v353_v38, %v812_v32 }
 0x119   :  { %v329_v46 = vmul.f32 1.442695, %v323_v40  ;;  %v326_v47 = vmul.f32 0.5, %v544_v41  ;;  %v368_v48 = vrot.slane %v354_v42, %v812_v32 }
 0x11a   :  { %v333_v49 = vmul.f32 1.442695, %v325_v43  ;;  %v331_v50 = vmul.f32 1.442695, %v324_v44 }
 0x11b   :  { %573 = vpow2.f32 %v329_v46  ;;  %v335_v52 = vmul.f32 1.442695, %v326_v47  ;;  %v382_v53 = vcombine.high %v361_v45, %v368_v48  ;;  %v830_v54 = vpop.f32.mrb[2].mxu0  ;;  %v369_v55 = vcombine.low %v361_v45, %v368_v48 }
 0x11c   :  { %575 = vpow2.f32 %v333_v49  ;;  %v545_v56 = vclamps-f32 %v830_v54, 10.0  ;;  %v833_v57 = vpop.f32.mrb[3].mxu0 }
 0x11d   :  { %577 = vpow2.f32 %v331_v50  ;;  %386 = vst [vmem:[#allocation11] sm:$0xff] %v382_v53  ;;  %v546_v58 = vclamps-f32 %v833_v57, 10.0  ;;  %v370_v59 = vcombine.low %v830_v54, %v833_v57  ;;  %380 = vst [vmem:[#allocation9] sm:$0xff] %v369_v55 }
 0x11e   :  { %579 = vpow2.f32 %v335_v52  ;;  %v327_v61 = vmul.f32 0.5, %v545_v56 }
 0x11f   :  { %v328_v62 = vmul.f32 0.5, %v546_v58  ;;  %v377_v63 = vrot.slane %v370_v59, %v812_v32  ;;  %547 = vst.sshfl [vmem:[#allocation9 + $0x8] sm:$0x33 pattern:$0x76325410] %v370_v59 }
 0x120   :  { %v337_v0 = vmul.f32 1.442695, %v327_v61 }
 0x121   :  { %662 = shalt.err (!%p659_p0)
}
 0x122   :  { %s663_s10 = scalar_lea.hbm %s890_s4, 192 }
 0x123   :  { %p664_p1 = scmp.ne.s32.totalorder %s890_s4, %s663_s10  ;;  %p667_p2 = scmp.lt.u32.totalorder %s663_s10, %s890_s4 }
 0x125   :  { %p669_p3 = pnand %p667_p2, %p664_p1 }
 0x127   :  { %672 = shalt.err (!%p669_p3)
}
 0x128   :  { %508 = dma.vmem_to_hbm [thread:$0]  %s506_s29, 192, %s890_s4, [#allocation10]   ;;  %v339_v1 = vmul.f32 1.442695, %v328_v62  ;;  %v383_v2 = vcombine.high %v377_v63, %v377_v63  ;;  %v399_v3 = vrot.slane %v392_v60, %v812_v32  ;;  %581 = vpow2.f32 %v337_v0  ;;  %v572_v5 = vld [vmem:[#allocation7 + $0x8] ss:$0 sps:$4 sm:$0xff]  }
 0x129   :  { %v406_v4 = vrot.slane %v388_v51, %v812_v32  ;;  %s673_s17 = scalar_lea.vmem %s516_s6, 192  ;;  %p678_p5 = scmp.lt.s32.totalorder %s516_s6, %s516_s6 }
 0x12a   :  { %583 = vpow2.f32 %v339_v1  ;;  %387 = vst [vmem:[#allocation11 + $0x8] sm:$0xf] %v383_v2  ;;  %p674_p4 = scmp.ne.s32.totalorder %s516_s6, %s673_s17  ;;  %p679_p6 = scmp.lt.s32.totalorder %s673_s17, %s673_s17 }
 0x12c   :  { %p680_p7 = por %p679_p6, %p678_p5 }
 0x12e   :  { %p681_p8 = pnand %p680_p7, %p674_p4 }
 0x130   :  { %684 = shalt.err (!%p681_p8)
}
 0x131   :  { %s685_s18 = scalar_lea.hbm %s891_s5, 192 }
 0x132   :  { %p686_p9 = scmp.ne.s32.totalorder %s891_s5, %s685_s18  ;;  %p689_p10 = scmp.lt.u32.totalorder %s685_s18, %s891_s5 }
 0x134   :  { %p691_p11 = pnand %p689_p10, %p686_p9 }
 0x136   :  { %694 = shalt.err (!%p691_p11)
}
 0x137   :  { %518 = dma.vmem_to_hbm [thread:$0]  %s516_s6, 192, %s891_s5, [#allocation10]   ;;  %v574_v6 = vpop.eup %573  ;;  %v407_v9 = vcombine.high %v399_v3, %v399_v3  ;;  %v408_v12 = vcombine.high %v406_v4, %v406_v4  ;;  %v416_v16 = vrot.slane %v572_v5, %v812_v32 }
 0x138   :  { %v576_v7 = vpop.eup %575  ;;  %v341_v8 = vadd.f32 1e-05, %v574_v6  ;;  %s734_s5 = smov [#allocation8]  }
 0x139   :  { %v578_v10 = vpop.eup %577  ;;  %v343_v11 = vadd.f32 1e-05, %v576_v7  ;;  %v417_v26 = vcombine.high %v416_v16, %v416_v16  ;;  %s495_s25 = sshll.u32 %s734_s5, 4  ;;  %s496_s25 = int_to_ptr.vmem [resolvable:$true] %s495_s25 }
 0x13a   :  { %v580_v13 = vpop.eup %579  ;;  %v424_v14 = vmul.f32 %v399_v3, %v341_v8  ;;  %v342_v15 = vadd.f32 1e-05, %v578_v10  ;;  %s695_s26 = scalar_lea.vmem %s496_s25, 192  ;;  %p700_p13 = scmp.lt.s32.totalorder %s496_s25, %s496_s25 }
 0x13b   :  { %v426_v17 = vmul.f32 %v406_v4, %v343_v11  ;;  %v344_v18 = vadd.f32 1e-05, %v580_v13  ;;  %v582_v23 = vpop.eup %581  ;;  %p696_p12 = scmp.ne.s32.totalorder %s496_s25, %s695_s26  ;;  %p701_p0 = scmp.lt.s32.totalorder %s695_s26, %s695_s26 }
 0x13c   :  { %v436_v19 = vrot.slane %v424_v14, 2  ;;  %v425_v20 = vmul.f32 %v407_v9, %v342_v15  ;;  %v584_v27 = vpop.eup %583  ;;  %v345_v30 = vadd.f32 1e-05, %v582_v23 }
 0x13d   :  { %v438_v21 = vrot.slane %v426_v17, 2  ;;  %v427_v22 = vmul.f32 %v408_v12, %v344_v18  ;;  %v346_v36 = vadd.f32 1e-05, %v584_v27  ;;  %p702_p1 = por %p701_p0, %p700_p13 }
 0x13e   :  { %v448_v24 = vadd.f32 %v436_v19, %v810_v31  ;;  %v437_v25 = vrot.slane %v425_v20, 2  ;;  %v428_v38 = vmul.f32 %v416_v16, %v345_v30 }
 0x13f   :  { %v450_v28 = vadd.f32 %v438_v21, %v815_v34  ;;  %v439_v29 = vrot.slane %v427_v22, 2  ;;  %v429_v41 = vmul.f32 %v417_v26, %v346_v36  ;;  %p703_p2 = pnand %p702_p1, %p696_p12 }
 0x140   :  { %v449_v33 = vadd.f32 %v437_v25, %v817_v35  ;;  %v440_v43 = vrot.slane %v428_v38, 2 }
 0x141   :  { %v451_v37 = vadd.f32 %v439_v29, %v823_v39  ;;  %v441_v44 = vrot.slane %v429_v41, 2 }
 0x142   :  { %v460_v40 = vcombine.low %v448_v24, %v449_v33  ;;  %v452_v46 = vadd.f32 %v440_v43, %v830_v54 }
 0x143   :  { %v461_v42 = vcombine.low %v450_v28, %v451_v37  ;;  %v453_v34 = vadd.f32 %v441_v44, %v833_v57 }
 0x144   :  { %v468_v31 = vrot.slane %v460_v40, %v812_v32 }
 0x145   :  { %v475_v45 = vrot.slane %v461_v42, %v812_v32  ;;  %v477_v47 = vcombine.low %v452_v46, %v453_v34 }
 0x147   :  { %v476_v35 = vcombine.low %v468_v31, %v475_v45  ;;  %548 = vst.sshfl [vmem:[#allocation8 + $0x8] sm:$0x33 pattern:$0x76325410] %v477_v47 }
 0x149   :  { %487 = vst [vmem:[#allocation8] sm:$0xff] %v476_v35 }
 0x14a   :  { %706 = shalt.err (!%p703_p2)
}
 0x14b   :  { %s707_s28 = scalar_lea.hbm %s889_s3, 192 }
 0x14c   :  { %p708_p3 = scmp.ne.s32.totalorder %s889_s3, %s707_s28  ;;  %p711_p4 = scmp.lt.u32.totalorder %s707_s28, %s889_s3 }
 0x14e   :  { %p713_p5 = pnand %p711_p4, %p708_p3 }
 0x150   :  { %716 = shalt.err (!%p713_p5)
}
 0x151   :  { %498 = dma.vmem_to_hbm [thread:$0]  %s496_s25, 192, %s889_s3, [#allocation4]  }
 0x152   :  { %721 = dma.done.wait [#allocation4], 192  }
 0x153   :  { %722 = vsyncadd [#allocation4], 4294967104 }
 0x154   :  { %723 = dma.done.wait [#allocation10], 384  }
 0x155   :  { %724 = vsyncadd [#allocation10], 4294966912 }
 0x156   :  { %528 = vsyncpa [#allocation3], 1 }
 0x157   :  { %529 = vsyncpa [#allocation6], 1 }
 0x158   :  { %530 = vsyncpa [#allocation4], 1 }
 0x159   :  { %531 = vsyncpa [#allocation10], 1 }

</bundles_post_ra>
